<compile_context>
chip_gen: v6e
topology: v6e:2x2x1
jax: 0.10.0
libtpu: 0.0.40
codegen_flags: <defaults>
</compile_context>

<pallas_src>
import jax
import jax.numpy as jnp
from jax.experimental import pallas as pl
from jax.experimental.pallas import tpu as pltpu

HIDDEN = 100          # logical hidden width (matches the PyTorch module)
LANE = 128            # TPU lane width — hidden dim is padded to this
TILE_B_MAX = 4096     # batch tile (multiple of 8; ~2 MiB of fp32 activations per tile)


def _round_up(n, m):
    return (n + m - 1) // m * m


def _mlp_kernel(x_ref, w1_ref, b1_ref, w2_ref, b2_ref, w3_ref, b3_ref, o_ref):
    """Fused 3-layer MLP on one batch tile. Weights/biases are VMEM-resident."""
    x = x_ref[...]
    # Layer 1: Linear + ReLU  (K = input_dim, N = 128 padded)
    h1 = jnp.dot(x, w1_ref[...], preferred_element_type=jnp.float32)
    h1 = jnp.maximum(h1 + b1_ref[...], 0.0)
    # Layer 2: Linear + ReLU  (128 x 128 — one MXU tile)
    h2 = jnp.dot(h1, w2_ref[...], preferred_element_type=jnp.float32)
    h2 = jnp.maximum(h2 + b2_ref[...], 0.0)
    # Output layer: Linear (no activation). Only the logical out_dim columns are stored.
    out = jnp.dot(h2, w3_ref[...], preferred_element_type=jnp.float32)
    o_ref[...] = (out + b3_ref[...]).astype(o_ref.dtype)


def prepare_params(params):
    """Zero-pad the hidden dim to 128 lanes ONCE (hoisted out of the forward path).

    Zero padding preserves the math exactly: padded b1/b2 columns are zero, the
    corresponding rows of w2/w3 are zero, so the extra lanes stay zero through ReLU.
    The output feature dim is intentionally NOT padded (narrow lane-masked store is
    cheaper than 32x HBM writeback inflation).
    """
    w1, b1 = params["w1"], params["b1"]
    w2, b2 = params["w2"], params["b2"]
    w3, b3 = params["w3"], params["b3"]
    hidden = w1.shape[1]
    hid_p = _round_up(hidden, LANE)
    pad_h = hid_p - hidden
    return {
        "w1": jnp.pad(w1, ((0, 0), (0, pad_h))),
        "b1": jnp.pad(b1, ((0, 0), (0, pad_h))),
        "w2": jnp.pad(w2, ((0, pad_h), (0, pad_h))),
        "b2": jnp.pad(b2, ((0, 0), (0, pad_h))),
        "w3": jnp.pad(w3, ((0, pad_h), (0, 0))),
        "b3": b3,
    }


def network_forward(x, padded_params):
    """x: (B, input_dim) float32; padded_params: output of prepare_params()."""
    w1p, b1p = padded_params["w1"], padded_params["b1"]
    w2p, b2p = padded_params["w2"], padded_params["b2"]
    w3p, b3p = padded_params["w3"], padded_params["b3"]
    B, in_dim = x.shape
    hid_p = w1p.shape[1]
    out_dim = w3p.shape[1]

    # ---- batch tiling ----
    # Cap tile_b at ceil(B/2) (rounded up to 8) so the grid has >= 2 steps whenever
    # possible: on v7x the "parallel" batch axis is then sharded across both TensorCores.
    tile_b = min(TILE_B_MAX, max(8, _round_up(pl.cdiv(B, 2), 8)))
    b_pad = _round_up(B, tile_b)
    xp = jnp.pad(x, ((0, b_pad - B), (0, 0))) if b_pad != B else x
    grid = (b_pad // tile_b,)

    flops = 2 * b_pad * (in_dim * hid_p + hid_p * hid_p + hid_p * out_dim)
    bytes_accessed = 4 * (
        b_pad * in_dim + b_pad * out_dim                      # activations in/out
        + in_dim * hid_p + hid_p * hid_p + hid_p * out_dim    # weights
        + 2 * hid_p + out_dim                                 # biases
    )

    out_padded = pl.pallas_call(
        _mlp_kernel,
        out_shape=jax.ShapeDtypeStruct((b_pad, out_dim), jnp.float32),
        grid=grid,
        in_specs=[
            pl.BlockSpec((tile_b, in_dim), lambda i: (i, 0)),   # x: tiled on batch
            pl.BlockSpec(w1p.shape, lambda i: (0, 0)),          # weights/biases: resident
            pl.BlockSpec(b1p.shape, lambda i: (0, 0)),
            pl.BlockSpec(w2p.shape, lambda i: (0, 0)),
            pl.BlockSpec(b2p.shape, lambda i: (0, 0)),
            pl.BlockSpec(w3p.shape, lambda i: (0, 0)),
            pl.BlockSpec(b3p.shape, lambda i: (0, 0)),
        ],
        out_specs=pl.BlockSpec((tile_b, out_dim), lambda i: (i, 0)),
        compiler_params=pltpu.CompilerParams(
            dimension_semantics=("parallel",),   # shard batch tiles across TCs (v7x)
            vmem_limit_bytes=32 * 1024 * 1024,   # explicit budget, safe on v5e/v6e/v7x
        ),
        cost_estimate=pl.CostEstimate(
            flops=int(flops), transcendentals=0, bytes_accessed=int(bytes_accessed)),
    )(xp, w1p, b1p, w2p, b2p, w3p, b3p)

    # Slice away batch padding (no lane padding on the output anymore).
    return out_padded[:B, :]


def init_params(key, input_dim, output_dim):
    """Deterministic synthetic init (mimics torch.nn.Linear uniform fan-in init)."""
    def linear(k, fan_in, fan_out):
        kw, kb = jax.random.split(k)
        bound = 1.0 / jnp.sqrt(jnp.float32(fan_in))
        # Stored transposed relative to PyTorch: (in, out) so kernel computes x @ W + b.
        w = jax.random.uniform(kw, (fan_in, fan_out), jnp.float32, -bound, bound)
        b = jax.random.uniform(kb, (1, fan_out), jnp.float32, -bound, bound)
        return w, b

    k1, k2, k3 = jax.random.split(key, 3)
    w1, b1 = linear(k1, input_dim, HIDDEN)
    w2, b2 = linear(k2, HIDDEN, HIDDEN)
    w3, b3 = linear(k3, HIDDEN, output_dim)
    return {"w1": w1, "b1": b1, "w2": w2, "b2": b2, "w3": w3, "b3": b3}


def network_reference(x, params):
    h1 = jnp.maximum(x @ params["w1"] + params["b1"], 0.0)
    h2 = jnp.maximum(h1 @ params["w2"] + params["b2"], 0.0)
    return h2 @ params["w3"] + params["b3"]


if __name__ == "__main__":
    key = jax.random.PRNGKey(0)
    k_params, k_x = jax.random.split(key)

    input_dim = 4      # small state vector (e.g. DQN state)
    output_dim = 4     # number of discrete actions
    batch = 8

    params = init_params(k_params, input_dim, output_dim)
    padded_params = prepare_params(params)        # pad once, reuse every forward
    x = jax.random.normal(k_x, (batch, input_dim), jnp.float32)

    out = network_forward(x, padded_params)
    out = jax.block_until_ready(out)

    ref = network_reference(x, params)
    assert out.shape == (batch, output_dim)
    assert jnp.allclose(out, ref, atol=1e-4, rtol=1e-4)

    # Also exercise a larger, non-multiple batch to cover tiling + padding + 2-step grid.
    x_big = jax.random.normal(jax.random.PRNGKey(1), (1000, input_dim), jnp.float32)
    out_big = jax.block_until_ready(network_forward(x_big, padded_params))
    ref_big = network_reference(x_big, params)
    assert out_big.shape == (1000, output_dim)
    assert jnp.allclose(out_big, ref_big, atol=1e-4, rtol=1e-4)

    print("KERNEL_OK")
</pallas_src>

<mosaic_0001>
module attributes {stable_mosaic.version = 11 : i64} {
  func.func @_mlp_kernel(%arg0: i32, %arg1: memref<8x4xf32, #tpu.memory_space<vmem>>, %arg2: memref<4x128xf32, #tpu.memory_space<vmem>>, %arg3: memref<1x128xf32, #tpu.memory_space<vmem>>, %arg4: memref<128x128xf32, #tpu.memory_space<vmem>>, %arg5: memref<1x128xf32, #tpu.memory_space<vmem>>, %arg6: memref<128x4xf32, #tpu.memory_space<vmem>>, %arg7: memref<1x4xf32, #tpu.memory_space<vmem>>, %arg8: memref<8x4xf32, #tpu.memory_space<vmem>>) attributes {dimension_semantics = [#tpu.dimension_semantics<parallel>], iteration_bounds = array<i64: 1>, scalar_prefetch = 0 : i64, scratch_operands = 0 : i64, tpu.core_type = #tpu.core_type<tc>, window_params = [{transform_indices = @transform_0, window_bounds = array<i64: 8, 4>}, {pipeline_mode = #tpu.pipeline_mode<synchronous>, transform_indices = @transform_1, window_bounds = array<i64: 4, 128>}, {pipeline_mode = #tpu.pipeline_mode<synchronous>, transform_indices = @transform_2, window_bounds = array<i64: 1, 128>}, {pipeline_mode = #tpu.pipeline_mode<synchronous>, transform_indices = @transform_3, window_bounds = array<i64: 128, 128>}, {pipeline_mode = #tpu.pipeline_mode<synchronous>, transform_indices = @transform_4, window_bounds = array<i64: 1, 128>}, {pipeline_mode = #tpu.pipeline_mode<synchronous>, transform_indices = @transform_5, window_bounds = array<i64: 128, 4>}, {pipeline_mode = #tpu.pipeline_mode<synchronous>, transform_indices = @transform_6, window_bounds = array<i64: 1, 4>}, {transform_indices = @transform_7, window_bounds = array<i64: 8, 4>}]} {
    %c0 = arith.constant 0 : index
    %c0_0 = arith.constant 0 : index
    %0 = vector.load %arg1[%c0, %c0_0] : memref<8x4xf32, #tpu.memory_space<vmem>>, vector<8x4xf32>
    %c0_1 = arith.constant 0 : index
    %c0_2 = arith.constant 0 : index
    %1 = vector.load %arg2[%c0_1, %c0_2] : memref<4x128xf32, #tpu.memory_space<vmem>>, vector<4x128xf32>
    %cst = arith.constant dense<0.000000e+00> : vector<8x128xf32>
    %2 = tpu.matmul %0, %1, %cst {dimension_numbers = #tpu.dot_dimension_numbers<[1], [0], [0], [1], [0, 0, 1, 1], [], []>} : vector<8x4xf32>, vector<4x128xf32>, vector<8x128xf32> -> vector<8x128xf32>
    %c0_3 = arith.constant 0 : index
    %c0_4 = arith.constant 0 : index
    %3 = vector.load %arg3[%c0_3, %c0_4] : memref<1x128xf32, #tpu.memory_space<vmem>>, vector<1x128xf32>
    %4 = vector.broadcast %3 : vector<1x128xf32> to vector<8x128xf32>
    %5 = arith.addf %2, %4 : vector<8x128xf32>
    %cst_5 = arith.constant 0.000000e+00 : f32
    %6 = vector.broadcast %cst_5 : f32 to vector<8x128xf32>
    %7 = arith.maximumf %5, %6 : vector<8x128xf32>
    %c0_6 = arith.constant 0 : index
    %c0_7 = arith.constant 0 : index
    %8 = vector.load %arg4[%c0_6, %c0_7] : memref<128x128xf32, #tpu.memory_space<vmem>>, vector<128x128xf32>
    %cst_8 = arith.constant dense<0.000000e+00> : vector<8x128xf32>
    %9 = tpu.matmul %7, %8, %cst_8 {dimension_numbers = #tpu.dot_dimension_numbers<[1], [0], [0], [1], [0, 0, 1, 1], [], []>} : vector<8x128xf32>, vector<128x128xf32>, vector<8x128xf32> -> vector<8x128xf32>
    %c0_9 = arith.constant 0 : index
    %c0_10 = arith.constant 0 : index
    %10 = vector.load %arg5[%c0_9, %c0_10] : memref<1x128xf32, #tpu.memory_space<vmem>>, vector<1x128xf32>
    %11 = vector.broadcast %10 : vector<1x128xf32> to vector<8x128xf32>
    %12 = arith.addf %9, %11 : vector<8x128xf32>
    %cst_11 = arith.constant 0.000000e+00 : f32
    %13 = vector.broadcast %cst_11 : f32 to vector<8x128xf32>
    %14 = arith.maximumf %12, %13 : vector<8x128xf32>
    %c0_12 = arith.constant 0 : index
    %c0_13 = arith.constant 0 : index
    %15 = vector.load %arg6[%c0_12, %c0_13] : memref<128x4xf32, #tpu.memory_space<vmem>>, vector<128x4xf32>
    %cst_14 = arith.constant dense<0.000000e+00> : vector<8x4xf32>
    %16 = tpu.matmul %14, %15, %cst_14 {dimension_numbers = #tpu.dot_dimension_numbers<[1], [0], [0], [1], [0, 0, 1, 1], [], []>} : vector<8x128xf32>, vector<128x4xf32>, vector<8x4xf32> -> vector<8x4xf32>
    %c0_15 = arith.constant 0 : index
    %c0_16 = arith.constant 0 : index
    %17 = vector.load %arg7[%c0_15, %c0_16] : memref<1x4xf32, #tpu.memory_space<vmem>>, vector<1x4xf32>
    %18 = vector.broadcast %17 : vector<1x4xf32> to vector<8x4xf32>
    %19 = arith.addf %16, %18 : vector<8x4xf32>
    %c0_17 = arith.constant 0 : index
    %c0_18 = arith.constant 0 : index
    %20 = vector.load %arg8[%c0_17, %c0_18] : memref<8x4xf32, #tpu.memory_space<vmem>>, vector<8x4xf32>
    tpu.vector_store %arg8[%c0_17, %c0_18], %19 {strides = array<i32>} : memref<8x4xf32, #tpu.memory_space<vmem>>, vector<8x4xf32>,
    return
  }
  func.func @transform_0(%arg0: i32) -> (i32, i32) {
    %c0_i32 = arith.constant 0 : i32
    %c0_i32_0 = arith.constant 0 : i32
    return %arg0, %c0_i32 : i32, i32
  }
  func.func @transform_1(%arg0: i32) -> (i32, i32) {
    %c0_i32 = arith.constant 0 : i32
    %c0_i32_0 = arith.constant 0 : i32
    %c0_i32_1 = arith.constant 0 : i32
    return %c0_i32, %c0_i32_0 : i32, i32
  }
  func.func @transform_2(%arg0: i32) -> (i32, i32) {
    %c0_i32 = arith.constant 0 : i32
    %c0_i32_0 = arith.constant 0 : i32
    %c0_i32_1 = arith.constant 0 : i32
    return %c0_i32, %c0_i32_0 : i32, i32
  }
  func.func @transform_3(%arg0: i32) -> (i32, i32) {
    %c0_i32 = arith.constant 0 : i32
    %c0_i32_0 = arith.constant 0 : i32
    %c0_i32_1 = arith.constant 0 : i32
    return %c0_i32, %c0_i32_0 : i32, i32
  }
  func.func @transform_4(%arg0: i32) -> (i32, i32) {
    %c0_i32 = arith.constant 0 : i32
    %c0_i32_0 = arith.constant 0 : i32
    %c0_i32_1 = arith.constant 0 : i32
    return %c0_i32, %c0_i32_0 : i32, i32
  }
  func.func @transform_5(%arg0: i32) -> (i32, i32) {
    %c0_i32 = arith.constant 0 : i32
    %c0_i32_0 = arith.constant 0 : i32
    %c0_i32_1 = arith.constant 0 : i32
    return %c0_i32, %c0_i32_0 : i32, i32
  }
  func.func @transform_6(%arg0: i32) -> (i32, i32) {
    %c0_i32 = arith.constant 0 : i32
    %c0_i32_0 = arith.constant 0 : i32
    %c0_i32_1 = arith.constant 0 : i32
    return %c0_i32, %c0_i32_0 : i32, i32
  }
  func.func @transform_7(%arg0: i32) -> (i32, i32) {
    %c0_i32 = arith.constant 0 : i32
    %c0_i32_0 = arith.constant 0 : i32
    return %arg0, %c0_i32 : i32, i32
  }
}

</mosaic_0001>

<bundles_post_ra>
// kernel: tpu_custom_call.1
= control target key start
LH: loop header
LB: loop body
LE: loop exit
PB: predicated region body
PF: predicated region fallthrough
CT: control target
= control target key end

     0   :  { %vm39_vm0 = vcmask 1043456   ;;  %vm35_vm1 = vcmask 31744   ;;  %v424_v0 = vmov 0.0   ;;  %vm425_vm2 = vmmov 0   ;;  %s621_s1 = inlined_call_operand.vmem [shape: f32[4,128], index: 1, kind: input, shape index: {}]   ;;  %s622_s0 = inlined_call_operand.vmem [shape: f32[8,4], index: 0, kind: input, shape index: {}]   ;;  %s623_s3 = inlined_call_operand.vmem [shape: f32[128,128], index: 3, kind: input, shape index: {}]   ;;  %s624_s5 = inlined_call_operand.vmem [shape: f32[128,4], index: 5, kind: input, shape index: {}]   ;;  %s625_s2 = inlined_call_operand.vmem [shape: f32[1,128], index: 2, kind: input, shape index: {}]   ;;  %s626_s4 = inlined_call_operand.vmem [shape: f32[1,128], index: 4, kind: input, shape index: {}]   ;;  %s627_s6 = inlined_call_operand.vmem [shape: f32[1,4], index: 6, kind: input, shape index: {}]   ;;  %s628_s7 = inlined_call_operand.vmem [shape: f32[8,4], index: 7, kind: output, shape index: {}]  }
   0x1   :  { %347 = vmatprep.subr.mxu0 %v424_v0  ;;  %v27_v1 = vld [vmem:[%s621_s1] sm:$0xf]  ;;  %349 = vmatprep.mubr.msk.f32.mxu0 %vm425_vm2, %v424_v0  ;;  %v129_v3 = vld [vmem:[%s623_s3 + $0x78] sm:$0xff]  ;;  %v128_v4 = vld [vmem:[%s623_s3 + $0x70] sm:$0xff] }
   0x2   :  { %v26_v2 = vld [vmem:[%s622_s0] sm:$0xff]  ;;  %348 = vmatpush3.msk.msra.mxu0 %vm39_vm0, %v27_v1  ;;  %352 = vmatprep.subr.mxu1 %v424_v0  ;;  %v127_v5 = vld [vmem:[%s623_s3 + $0x68] sm:$0xff]  ;;  %v125_v7 = vld [vmem:[%s623_s3 + $0x58] sm:$0xff] }
   0x3   :  { %350 = vmatmul.mubr.msk.f32.vlgmr.msra.gmra.mxu0 %vm35_vm1, %v26_v2  ;;  %353 = vmatpush3.msra.mxu1 %v129_v3  ;;  %v126_v6 = vld [vmem:[%s623_s3 + $0x60] sm:$0xff]  ;;  %v124_v8 = vld [vmem:[%s623_s3 + $0x50] sm:$0xff]  ;;  %v123_v9 = vld [vmem:[%s623_s3 + $0x48] sm:$0xff] }
   0x4   :  { %354 = vmatprep.subr.mxu1 %v424_v0  ;;  %384 = vmatprep.mubr.msk.f32.mxu1 %vm425_vm2, %v424_v0  ;;  %v122_v10 = vld [vmem:[%s623_s3 + $0x40] sm:$0xff]  ;;  %v121_v11 = vld [vmem:[%s623_s3 + $0x38] sm:$0xff]  ;;  %v120_v12 = vld [vmem:[%s623_s3 + $0x30] sm:$0xff] }
   0x5   :  { %355 = vmatpush3.msra.mxu1 %v128_v4  ;;  %387 = vmatprep.subr.mxu0 %v424_v0  ;;  %v119_v13 = vld [vmem:[%s623_s3 + $0x28] sm:$0xff]  ;;  %v118_v14 = vld [vmem:[%s623_s3 + $0x20] sm:$0xff]  ;;  %v117_v15 = vld [vmem:[%s623_s3 + $0x18] sm:$0xff] }
   0x6   :  { %356 = vmatprep.subr.mxu1 %v424_v0  ;;  %419 = vmatprep.mubr.msk.f32.mxu0 %vm425_vm2, %v424_v0  ;;  %v116_v16 = vld [vmem:[%s623_s3 + $0x10] sm:$0xff]  ;;  %v115_v17 = vld [vmem:[%s623_s3 + $0x8] sm:$0xff]  ;;  %v114_v18 = vld [vmem:[%s623_s3] sm:$0xff] }
   0x7   :  { %357 = vmatpush3.msra.mxu1 %v127_v5  ;;  %v223_v19 = vld [vmem:[%s624_s5 + $0x78] sm:$0xff]  ;;  %v222_v20 = vld [vmem:[%s624_s5 + $0x70] sm:$0xff]  ;;  %v221_v21 = vld [vmem:[%s624_s5 + $0x68] sm:$0xff] }
   0x8   :  { %358 = vmatprep.subr.mxu1 %v424_v0  ;;  %388 = vmatpush3.msra.mxu0 %v223_v19  ;;  %v220_v22 = vld [vmem:[%s624_s5 + $0x60] sm:$0xff]  ;;  %v219_v23 = vld [vmem:[%s624_s5 + $0x58] sm:$0xff]  ;;  %v218_v24 = vld [vmem:[%s624_s5 + $0x50] sm:$0xff] }
   0x9   :  { %359 = vmatpush3.msra.mxu1 %v126_v6  ;;  %389 = vmatprep.subr.mxu0 %v424_v0  ;;  %v217_v25 = vld [vmem:[%s624_s5 + $0x48] sm:$0xff]  ;;  %v216_v26 = vld [vmem:[%s624_s5 + $0x40] sm:$0xff]  ;;  %v215_v27 = vld [vmem:[%s624_s5 + $0x38] sm:$0xff] }
   0xa   :  { %360 = vmatprep.subr.mxu1 %v424_v0  ;;  %390 = vmatpush3.msra.mxu0 %v222_v20  ;;  %v214_v28 = vld [vmem:[%s624_s5 + $0x30] sm:$0xff]  ;;  %v213_v29 = vld [vmem:[%s624_s5 + $0x28] sm:$0xff]  ;;  %v212_v30 = vld [vmem:[%s624_s5 + $0x20] sm:$0xff] }
   0xb   :  { %361 = vmatpush3.msra.mxu1 %v125_v7  ;;  %391 = vmatprep.subr.mxu0 %v424_v0  ;;  %v211_v31 = vld [vmem:[%s624_s5 + $0x18] sm:$0xff]  ;;  %v306_v32 = vld [vmem:[%s625_s2] ss:$0 sm:$0xff]  ;;  %v210_v37 = vld [vmem:[%s624_s5 + $0x10] sm:$0xff] }
   0xc   :  { %362 = vmatprep.subr.mxu1 %v424_v0  ;;  %392 = vmatpush3.msra.mxu0 %v221_v21  ;;  %v209_v38 = vld [vmem:[%s624_s5 + $0x8] sm:$0xff]  ;;  %v208_v39 = vld [vmem:[%s624_s5] sm:$0xff] }
   0xd   :  { %363 = vmatpush3.msra.mxu1 %v124_v8  ;;  %393 = vmatprep.subr.mxu0 %v424_v0  ;;  %v309_v40 = vld [vmem:[%s626_s4] ss:$0 sm:$0xff] }
   0xe   :  { %364 = vmatprep.subr.mxu1 %v424_v0  ;;  %394 = vmatpush3.msra.mxu0 %v220_v22  ;;  %v310_v45 = vld [vmem:[%s627_s6] ss:$0 sm:$0xff] }
   0xf   :  { %365 = vmatpush3.msra.mxu1 %v123_v9  ;;  %395 = vmatprep.subr.mxu0 %v424_v0 }
  0x10   :  { %366 = vmatprep.subr.mxu1 %v424_v0  ;;  %396 = vmatpush3.msra.mxu0 %v219_v23 }
  0x11   :  { %367 = vmatpush3.msra.mxu1 %v122_v10  ;;  %397 = vmatprep.subr.mxu0 %v424_v0 }
  0x12   :  { %368 = vmatprep.subr.mxu1 %v424_v0  ;;  %398 = vmatpush3.msra.mxu0 %v218_v24 }
  0x13   :  { %369 = vmatpush3.msra.mxu1 %v121_v11  ;;  %399 = vmatprep.subr.mxu0 %v424_v0 }
  0x14   :  { %370 = vmatprep.subr.mxu1 %v424_v0  ;;  %400 = vmatpush3.msra.mxu0 %v217_v25 }
  0x15   :  { %371 = vmatpush3.msra.mxu1 %v120_v12  ;;  %401 = vmatprep.subr.mxu0 %v424_v0 }
  0x16   :  { %372 = vmatprep.subr.mxu1 %v424_v0  ;;  %402 = vmatpush3.msra.mxu0 %v216_v26 }
  0x17   :  { %373 = vmatpush3.msra.mxu1 %v119_v13  ;;  %403 = vmatprep.subr.mxu0 %v424_v0 }
  0x18   :  { %374 = vmatprep.subr.mxu1 %v424_v0  ;;  %404 = vmatpush3.msra.mxu0 %v215_v27 }
  0x19   :  { %375 = vmatpush3.msra.mxu1 %v118_v14  ;;  %405 = vmatprep.subr.mxu0 %v424_v0 }
  0x1a   :  { %376 = vmatprep.subr.mxu1 %v424_v0  ;;  %406 = vmatpush3.msra.mxu0 %v214_v28 }
  0x1b   :  { %377 = vmatpush3.msra.mxu1 %v117_v15  ;;  %407 = vmatprep.subr.mxu0 %v424_v0 }
  0x1c   :  { %378 = vmatprep.subr.mxu1 %v424_v0  ;;  %408 = vmatpush3.msra.mxu0 %v213_v29 }
  0x1d   :  { %379 = vmatpush3.msra.mxu1 %v116_v16  ;;  %409 = vmatprep.subr.mxu0 %v424_v0 }
  0x1e   :  { %380 = vmatprep.subr.mxu1 %v424_v0  ;;  %410 = vmatpush3.msra.mxu0 %v212_v30 }
  0x1f   :  { %381 = vmatpush3.msra.mxu1 %v115_v17  ;;  %411 = vmatprep.subr.mxu0 %v424_v0 }
  0x20   :  { %382 = vmatprep.subr.mxu1 %v424_v0  ;;  %412 = vmatpush3.msra.mxu0 %v211_v31 }
  0x21   :  { %383 = vmatpush3.msra.mxu1 %v114_v18  ;;  %413 = vmatprep.subr.mxu0 %v424_v0 }
  0x22   :  { %414 = vmatpush3.msra.mxu0 %v210_v37 }
  0x23   :  { %415 = vmatprep.subr.mxu0 %v424_v0 }
  0x24   :  { %416 = vmatpush3.msra.mxu0 %v209_v38 }
  0x25   :  { %417 = vmatprep.subr.mxu0 %v424_v0 }
  0x26   :  { %418 = vmatpush3.msra.mxu0 %v208_v39 }
  0xc3   :  { %v109_v33 = vpop.f32.mrf.mxu0 }
  0xc4   :  { %v110_v34 = vadd.f32 %v306_v32, %v109_v33 }
  0xc5   :  { %v351_v35 = vpop.f32.mrf.mxu0 }
  0xc6   :  { %v113_v36 = vmax.f32 %v110_v34, 0.0 }
  0xc8   :  { %385 = vmatmul.mubr.f32.vlgmr.msra.gmra.mxu1 %v113_v36 }
 0x188   :  { %v203_v41 = vpop.f32.mrf.mxu1 }
 0x189   :  { %v204_v42 = vadd.f32 %v309_v40, %v203_v41 }
 0x18a   :  { %v386_v43 = vpop.f32.mrf.mxu1 }
 0x18b   :  { %v207_v44 = vmax.f32 %v204_v42, 0.0 }
 0x18d   :  { %420 = vmatmul.mubr.f32.vlgmr.msra.gmra.mxu0 %v207_v44 }
 0x24d   :  { %v297_v46 = vpop.f32.mrf.mxu0 }
 0x24e   :  { %v298_v47 = vadd.f32 %v310_v45, %v297_v46 }
 0x24f   :  { %v421_v48 = vpop.f32.mrf.mxu0 }
 0x250   :  { %301 = vst.msk [vmem:[%s628_s7] sm:$0xff] %vm35_vm1, %v298_v47 }

</bundles_post_ra>
